<compile_context>
chip_gen: v7x
topology: tpu7x:2x2x1
jax: 0.10.0
libtpu: 0.0.40
codegen_flags: <defaults>
</compile_context>

<pallas_src>
import math

import jax
import jax.numpy as jnp
from jax import lax
from jax.experimental import pallas as pl
from jax.experimental.pallas import tpu as pltpu

W = 10.0
E = 2.0
INV_E = 1.0 / E
C = W - W * math.log(1.0 + W / E)


def _tpu_flavor():
    """(is_v7x, num_tensorcores) — conservative, string-based detection."""
    try:
        kind = jax.devices()[0].device_kind.lower()
    except Exception:
        kind = ""
    is_v7 = ("v7" in kind) or ("7x" in kind)
    # v7x has 2 TensorCores per chip; v5e/v6e have 1 (parallel split is a
    # pointless serial loop there, so keep it at 1).
    return is_v7, (2 if is_v7 else 1)


def _make_kernel(blocks_per_p, nslabs, tail_slabs, last_blk, lane):
    """Build the kernel.  All sizing arguments are static Python ints."""

    def _accumulate(x_ref, t_ref, n_slabs):
        # Stream the block in 8-row slabs; keep the (8, lane) partial sum in
        # registers (fori_loop carry) so no block-sized temporary ever hits
        # VMEM and o_ref is read-modify-written only once per grid step.
        def slab(s, acc):
            r0 = pl.multiple_of(s * 8, 8)
            xs = x_ref[pl.ds(r0, 8), :].astype(jnp.float32)
            ts = t_ref[pl.ds(r0, 8), :].astype(jnp.float32)
            # weight == 0 where t == -1 -> zero contribution (fused select).
            # NOTE: unlike weight*(x-t), this maps non-finite x/t at masked
            # positions to 0 instead of NaN — only differs for pathological
            # inputs.
            d = jnp.where(ts == -1.0, 0.0, xs - ts)
            a = jnp.abs(d)
            y = jnp.where(a < W, W * jnp.log1p(a * INV_E), a - C)
            return acc + y

        return lax.fori_loop(0, n_slabs, slab,
                             jnp.zeros((8, lane), jnp.float32),
                             unroll=min(4, n_slabs))

    def kernel(x_ref, t_ref, o_ref):
        # Inner grid axis is the reduction ("arbitrary"); this (8, lane)
        # output block stays resident in VMEM for the whole p-chunk.
        @pl.when(pl.program_id(1) == 0)
        def _init():
            o_ref[...] = jnp.zeros_like(o_ref)

        if tail_slabs is None:
            o_ref[...] += _accumulate(x_ref, t_ref, nslabs)
        else:
            # Only the globally-last block is partial; it just runs fewer
            # slabs (static count) — the undefined tail rows of the partial
            # DMA are never read.
            blk = pl.program_id(0) * blocks_per_p + pl.program_id(1)

            @pl.when(blk != last_blk)
            def _full():
                o_ref[...] += _accumulate(x_ref, t_ref, nslabs)

            @pl.when(blk == last_blk)
            def _tail():
                o_ref[...] += _accumulate(x_ref, t_ref, tail_slabs)

    return kernel


def wing_loss(x, t, *, target_block_bytes=None):
    assert x.shape == t.shape, (x.shape, t.shape)
    total = x.size
    if total == 0:
        return jnp.zeros((), jnp.float32)

    is_v7, ncores = _tpu_flavor()
    if target_block_bytes is None:
        # ~2 MiB/input is near HBM roofline on v5e/v6e; v7x's 3.2 TB/s wants
        # bigger blocks to amortize the ~0.35 us per-grid-step overhead.
        target_block_bytes = (4 if is_v7 else 2) * 1024 * 1024

    xf = x.reshape(-1)
    tf = t.reshape(-1)

    # Lane-dense row width making (rows, lane) a zero-copy reshape with
    # rows % 8 == 0.  Only for awkward totals do we pad, and then only up to
    # the next 8*lane boundary (t = -1 padding contributes exactly 0).
    lane = None
    for cand in (512, 256, 128):
        if total % (8 * cand) == 0:
            lane = cand
            break
    if lane is None:
        lane = 512
        padded_total = -(-total // (8 * lane)) * (8 * lane)
        pad = padded_total - total
        xf = jnp.concatenate([xf, jnp.zeros((pad,), xf.dtype)])
        tf = jnp.concatenate([tf, jnp.full((pad,), -1, tf.dtype)])
        total = padded_total

    rows = total // lane
    x2 = xf.reshape(rows, lane)
    t2 = tf.reshape(rows, lane)

    # Block sizing: multiple of 8 rows, ~target_block_bytes per input.
    itemsize = max(x2.dtype.itemsize, 4)
    tgt_rows = max(8, (target_block_bytes // (itemsize * lane)) // 8 * 8)
    block_rows = min(tgt_rows, rows)
    assert rows % 8 == 0 and block_rows % 8 == 0, (rows, block_rows)

    total_blocks = -(-rows // block_rows)

    # 2-way TensorCore split only on v7x and only when it divides evenly
    # (avoids fully out-of-bounds blocks and uneven chunks).
    if ncores > 1 and total_blocks >= ncores and total_blocks % ncores == 0:
        p_dim = ncores
    else:
        p_dim = 1
    blocks_per_p = total_blocks // p_dim

    needs_tail = total_blocks * block_rows != rows
    last_blk = total_blocks - 1
    tail_slabs = (rows - last_blk * block_rows) // 8 if needs_tail else None
    nslabs = block_rows // 8

    kernel = _make_kernel(blocks_per_p, nslabs, tail_slabs, last_blk, lane)

    block_bytes = block_rows * lane * itemsize
    vmem_limit = max(32 * 1024 * 1024, 4 * block_bytes + 4 * 1024 * 1024)

    partials = pl.pallas_call(
        kernel,
        out_shape=jax.ShapeDtypeStruct((p_dim * 8, lane), jnp.float32),
        grid_spec=pltpu.PrefetchScalarGridSpec(
            num_scalar_prefetch=0,
            grid=(p_dim, blocks_per_p),
            in_specs=[
                pl.BlockSpec((block_rows, lane),
                             lambda p, i: (p * blocks_per_p + i, 0)),
                pl.BlockSpec((block_rows, lane),
                             lambda p, i: (p * blocks_per_p + i, 0)),
            ],
            out_specs=pl.BlockSpec((8, lane), lambda p, i: (p, 0)),
        ),
        compiler_params=pltpu.CompilerParams(
            dimension_semantics=("parallel", "arbitrary"),
            vmem_limit_bytes=vmem_limit,
        ),
    )(x2, t2)

    # Tiny final reduction over the lane-dense per-chunk partials.
    return jnp.sum(partials)


def wing_loss_ref(x, t):
    x = x.astype(jnp.float32)
    t = t.astype(jnp.float32)
    weight = jnp.where(t == -1.0, 0.0, 1.0)
    abs_diff = jnp.abs(weight * (x - t))
    flag = (abs_diff < W).astype(jnp.float32)
    y = flag * W * jnp.log1p(abs_diff / E) + (1.0 - flag) * (abs_diff - C)
    return jnp.sum(y)


if __name__ == "__main__":
    key = jax.random.PRNGKey(0)

    def make_case(k, shape):
        kx, kt, km = jax.random.split(k, 3)
        # Scale so both wing branches (|d| < w and |d| >= w) are exercised.
        x = jax.random.normal(kx, shape, dtype=jnp.float32) * 15.0
        t = jax.random.normal(kt, shape, dtype=jnp.float32) * 5.0
        # Mark some targets as "missing" (-1) -> zero weight.
        mask = jax.random.bernoulli(km, 0.1, shape)
        t = jnp.where(mask, -1.0, t)
        return x, t

    cases = [
        # batch=8, 128 landmarks * (x,y) = 256 coords: zero-copy reshape path
        ((8, 256), {}),
        # awkward total -> minimal pad path (pads only to the next 8*lane)
        ((3, 1000), {}),
        # multi-block + partial last block (+ 2-TC split on v7x)
        ((10, 8192), dict(target_block_bytes=96 * 1024)),
    ]
    keys = jax.random.split(key, len(cases))
    for k, (shape, kw) in zip(keys, cases):
        x, t = make_case(k, shape)
        out = jax.block_until_ready(wing_loss(x, t, **kw))
        ref = jax.block_until_ready(wing_loss_ref(x, t))
        assert out.shape == (), f"expected scalar, got {out.shape}"
        assert jnp.allclose(out, ref, rtol=1e-4, atol=1e-2), (shape, out, ref)

    print("KERNEL_OK")
</pallas_src>

<mosaic_0001>
module attributes {stable_mosaic.version = 11 : i64} {
  func.func @kernel(%arg0: i32, %arg1: i32, %arg2: memref<8x256xf32, #tpu.memory_space<vmem>>, %arg3: memref<8x256xf32, #tpu.memory_space<vmem>>, %arg4: memref<8x256xf32, #tpu.memory_space<vmem>>) attributes {dimension_semantics = [#tpu.dimension_semantics<parallel>, #tpu.dimension_semantics<arbitrary>], iteration_bounds = array<i64: 1, 1>, scalar_prefetch = 0 : i64, scratch_operands = 0 : i64, tpu.core_type = #tpu.core_type<tc>, window_params = [{transform_indices = @transform_0, window_bounds = array<i64: 8, 256>}, {transform_indices = @transform_1, window_bounds = array<i64: 8, 256>}, {transform_indices = @transform_2, window_bounds = array<i64: 8, 256>}]} {
    %c0_i32 = arith.constant 0 : i32
    %0 = arith.cmpi eq, %arg1, %c0_i32 : i32
    %1 = arith.extui %0 : i1 to i32
    %c0_i32_0 = arith.constant 0 : i32
    %2 = arith.cmpi ne, %1, %c0_i32_0 : i32
    scf.if %2 {
      %cst_13 = arith.constant 0.000000e+00 : f32
      %30 = vector.broadcast %cst_13 : f32 to vector<8x256xf32>
      %c0_14 = arith.constant 0 : index
      %c0_15 = arith.constant 0 : index
      %31 = vector.load %arg4[%c0_14, %c0_15] : memref<8x256xf32, #tpu.memory_space<vmem>>, vector<8x256xf32>
      tpu.vector_store %arg4[%c0_14, %c0_15], %30 {strides = array<i32>} : memref<8x256xf32, #tpu.memory_space<vmem>>, vector<8x256xf32>,
    } else {
    }
    %c0 = arith.constant 0 : index
    %c0_1 = arith.constant 0 : index
    %3 = vector.load %arg4[%c0, %c0_1] : memref<8x256xf32, #tpu.memory_space<vmem>>, vector<8x256xf32>
    %cst = arith.constant 0.000000e+00 : f32
    %4 = vector.broadcast %cst : f32 to vector<8x256xf32>
    %c0_i32_2 = arith.constant 0 : i32
    %c8_i32 = arith.constant 8 : i32
    %5 = arith.muli %c0_i32_2, %c8_i32 : i32
    %6 = tpu.assume_multiple %5, 8 : i32
    %7 = arith.index_cast %6 : i32 to index
    %c0_3 = arith.constant 0 : index
    %8 = vector.load %arg2[%7, %c0_3] : memref<8x256xf32, #tpu.memory_space<vmem>>, vector<8x256xf32>
    %9 = arith.index_cast %6 : i32 to index
    %c0_4 = arith.constant 0 : index
    %10 = vector.load %arg3[%9, %c0_4] : memref<8x256xf32, #tpu.memory_space<vmem>>, vector<8x256xf32>
    %cst_5 = arith.constant -1.000000e+00 : f32
    %11 = vector.broadcast %cst_5 : f32 to vector<8x256xf32>
    %12 = arith.cmpf oeq, %10, %11 : vector<8x256xf32>
    %13 = arith.subf %8, %10 : vector<8x256xf32>
    %cst_6 = arith.constant 0.000000e+00 : f32
    %14 = vector.broadcast %cst_6 : f32 to vector<8x256xf32>
    %15 = arith.select %12, %14, %13 : vector<8x256xi1>, vector<8x256xf32>
    %16 = math.absf %15 : vector<8x256xf32>
    %cst_7 = arith.constant 1.000000e+01 : f32
    %17 = vector.broadcast %cst_7 : f32 to vector<8x256xf32>
    %18 = arith.cmpf olt, %16, %17 : vector<8x256xf32>
    %cst_8 = arith.constant 5.000000e-01 : f32
    %19 = vector.broadcast %cst_8 : f32 to vector<8x256xf32>
    %20 = arith.mulf %16, %19 : vector<8x256xf32>
    %21 = math.log1p %20 : vector<8x256xf32>
    %cst_9 = arith.constant 1.000000e+01 : f32
    %22 = vector.broadcast %cst_9 : f32 to vector<8x256xf32>
    %23 = arith.mulf %22, %21 : vector<8x256xf32>
    %cst_10 = arith.constant -7.9175949 : f32
    %24 = vector.broadcast %cst_10 : f32 to vector<8x256xf32>
    %25 = arith.subf %16, %24 : vector<8x256xf32>
    %26 = arith.select %18, %23, %25 : vector<8x256xi1>, vector<8x256xf32>
    %27 = arith.addf %4, %26 : vector<8x256xf32>
    %c1_i32 = arith.constant 1 : i32
    %28 = arith.addf %3, %27 : vector<8x256xf32>
    %c0_11 = arith.constant 0 : index
    %c0_12 = arith.constant 0 : index
    %29 = vector.load %arg4[%c0_11, %c0_12] : memref<8x256xf32, #tpu.memory_space<vmem>>, vector<8x256xf32>
    tpu.vector_store %arg4[%c0_11, %c0_12], %28 {strides = array<i32>} : memref<8x256xf32, #tpu.memory_space<vmem>>, vector<8x256xf32>,
    return
  }
  func.func @transform_0(%arg0: i32, %arg1: i32) -> (i32, i32) {
    %c1_i32 = arith.constant 1 : i32
    %0 = arith.muli %arg0, %c1_i32 : i32
    %1 = arith.addi %0, %arg1 : i32
    %c0_i32 = arith.constant 0 : i32
    %c0_i32_0 = arith.constant 0 : i32
    return %1, %c0_i32 : i32, i32
  }
  func.func @transform_1(%arg0: i32, %arg1: i32) -> (i32, i32) {
    %c1_i32 = arith.constant 1 : i32
    %0 = arith.muli %arg0, %c1_i32 : i32
    %1 = arith.addi %0, %arg1 : i32
    %c0_i32 = arith.constant 0 : i32
    %c0_i32_0 = arith.constant 0 : i32
    return %1, %c0_i32 : i32, i32
  }
  func.func @transform_2(%arg0: i32, %arg1: i32) -> (i32, i32) {
    %c0_i32 = arith.constant 0 : i32
    %c0_i32_0 = arith.constant 0 : i32
    return %arg0, %c0_i32 : i32, i32
  }
}

</mosaic_0001>

<bundles_post_ra>
// kernel: tpu_custom_call.1
= control target key start
LH: loop header
LB: loop body
LE: loop exit
PB: predicated region body
PF: predicated region fallthrough
CT: control target
= control target key end

     0   :  { %7 = vsyncpa [#allocation3], 0  ;;  %s257_s0 = inlined_call_operand.hbm [shape: f32[8,256], index: 0, kind: input, shape index: {}]   ;;  %s258_s1 = inlined_call_operand.hbm [shape: f32[8,256], index: 1, kind: input, shape index: {}]   ;;  %s259_s2 = inlined_call_operand.hbm [shape: f32[8,256], index: 2, kind: output, shape index: {}]  }
   0x1   :  { %8 = vsyncpa [#allocation6], 0 }
   0x2   :  { %9 = vsyncpa [#allocation4], 0  ;;  %s203_s9 = smov [#allocation2]   ;;  %s204_s11 = smov [#allocation5]  }
   0x3   :  { %s20_s10 = sshll.u32 %s203_s9, 4  ;;  %s34_s12 = sshll.u32 %s204_s11, 4  ;;  %s21_s10 = int_to_ptr.vmem [resolvable:$true] %s20_s10  ;;  %s35_s12 = int_to_ptr.vmem [resolvable:$true] %s34_s12 }
   0x4   :  { %s131_s15 = scalar_lea.hbm %s257_s0, 256 }
   0x5   :  { %p132_p0 = scmp.ne.s32.totalorder %s257_s0, %s131_s15  ;;  %p135_p1 = scmp.lt.u32.totalorder %s131_s15, %s257_s0 }
   0x7   :  { %p137_p2 = pnand %p135_p1, %p132_p0 }
   0x9   :  { %140 = shalt.err (!%p137_p2)
}
   0xa   :  { %s141_s20 = scalar_lea.vmem %s21_s10, 256  ;;  %p146_p4 = scmp.lt.s32.totalorder %s21_s10, %s21_s10 }
   0xb   :  { %p142_p3 = scmp.ne.s32.totalorder %s21_s10, %s141_s20  ;;  %p147_p5 = scmp.lt.s32.totalorder %s141_s20, %s141_s20 }
   0xd   :  { %p148_p6 = por %p147_p5, %p146_p4 }
   0xf   :  { %p149_p7 = pnand %p148_p6, %p142_p3 }
  0x11   :  { %152 = shalt.err (!%p149_p7)
}
  0x12   :  { %23 = dma.hbm_to_vmem [thread:$0]  %s257_s0, 256, %s21_s10, [#allocation3]  }
  0x13   :  { %s153_s25 = scalar_lea.hbm %s258_s1, 256 }
  0x14   :  { %p154_p8 = scmp.ne.s32.totalorder %s258_s1, %s153_s25  ;;  %p157_p9 = scmp.lt.u32.totalorder %s153_s25, %s258_s1 }
  0x16   :  { %p159_p10 = pnand %p157_p9, %p154_p8 }
  0x18   :  { %162 = shalt.err (!%p159_p10)
}
  0x19   :  { %s163_s30 = scalar_lea.vmem %s35_s12, 256  ;;  %p168_p12 = scmp.lt.s32.totalorder %s35_s12, %s35_s12 }
  0x1a   :  { %p164_p11 = scmp.ne.s32.totalorder %s35_s12, %s163_s30  ;;  %p169_p13 = scmp.lt.s32.totalorder %s163_s30, %s163_s30 }
  0x1c   :  { %p170_p0 = por %p169_p13, %p168_p12 }
  0x1e   :  { %p171_p1 = pnand %p170_p0, %p164_p11 }
  0x20   :  { %174 = shalt.err (!%p171_p1)
}
  0x21   :  { %37 = dma.hbm_to_vmem [thread:$0]  %s258_s1, 256, %s35_s12, [#allocation6]  }
  0x22   :  { %197 = dma.done.wait [#allocation3], 256  }
  0x23   :  { %198 = vsyncadd [#allocation3], 4294967040 }
  0x24   :  { %199 = dma.done.wait [#allocation6], 256  }
  0x25   :  { %200 = vsyncadd [#allocation6], 4294967040  ;;  %v57_v0 = vld [vmem:[#allocation2] sm:$0xff]  ;;  %v61_v1 = vld [vmem:[#allocation5] sm:$0xff]  ;;  %s205_s1 = smov [#allocation7]  }
  0x26   :  { %v58_v2 = vld [vmem:[#allocation2 + $0x8] sm:$0xff]  ;;  %vm63_vm0 = vcmp.eq.f32.partialorder %v61_v1, -1.0  ;;  %v65_v3 = vsub.f32 %v57_v0, %v61_v1  ;;  %v62_v4 = vld [vmem:[#allocation5 + $0x8] sm:$0xff]  ;;  %s111_s4 = sshll.u32 %s205_s1, 4  ;;  %s112_s4 = int_to_ptr.vmem [resolvable:$true] %s111_s4 }
  0x27   :  { %vm64_vm1 = vcmp.eq.f32.partialorder %v62_v4, -1.0  ;;  %v66_v5 = vsub.f32 %v58_v2, %v62_v4  ;;  %s175_s5 = scalar_lea.vmem %s112_s4, 256  ;;  %p180_p3 = scmp.lt.s32.totalorder %s112_s4, %s112_s4 }
  0x28   :  { %v67_v6 = vsel %vm63_vm0, 0.0, %v65_v3  ;;  %p176_p2 = scmp.ne.s32.totalorder %s112_s4, %s175_s5  ;;  %p181_p4 = scmp.lt.s32.totalorder %s175_s5, %s175_s5 }
  0x29   :  { %v69_v7 = vand.u32 2147483647, %v67_v6  ;;  %v68_v8 = vsel %vm64_vm1, 0.0, %v66_v5 }
  0x2a   :  { %v70_v9 = vand.u32 2147483647, %v68_v8  ;;  %p182_p5 = por %p181_p4, %p180_p3 }
  0x2b   :  { %v73_v10 = vmul.f32 0.5, %v69_v7  ;;  %v121_v25 = vadd.f32 7.917595, %v69_v7  ;;  %vm71_vm4 = vcmp.lt.f32.partialorder %v69_v7, 10.0 }
  0x2c   :  { %v74_v11 = vmul.f32 0.5, %v70_v9  ;;  %v122_v28 = vadd.f32 7.917595, %v70_v9  ;;  %vm72_vm5 = vcmp.lt.f32.partialorder %v70_v9, 10.0  ;;  %p183_p6 = pnand %p182_p5, %p176_p2 }
  0x2d   :  { %v75_v12 = vadd.f32 1.0, %v73_v10  ;;  %v78_v14 = vmul.f32 -0.5, %v73_v10  ;;  %v81_v17 = vand.u32 2147483647, %v73_v10 }
  0x2e   :  { %v84_v13 = vadd.f32 1.0, %v74_v11  ;;  %v87_v15 = vmul.f32 -0.5, %v74_v11  ;;  %v90_v19 = vand.u32 2147483647, %v74_v11 }
  0x2f   :  { %127 = vlog2.f32 %v75_v12  ;;  %v79_v16 = vadd.f32 1.0, %v78_v14  ;;  %vm82_vm2 = vcmp.lt.f32.partialorder %v81_v17, 0.0004427343 }
  0x30   :  { %129 = vlog2.f32 %v84_v13  ;;  %v88_v18 = vadd.f32 1.0, %v87_v15  ;;  %vm91_vm3 = vcmp.lt.f32.partialorder %v90_v19, 0.0004427343 }
  0x31   :  { %v80_v20 = vmul.f32 %v79_v16, %v73_v10 }
  0x32   :  { %v89_v22 = vmul.f32 %v88_v18, %v74_v11 }
  0x39   :  { %v128_v21 = vpop.eup %127 }
  0x3a   :  { %v130_v23 = vpop.eup %129  ;;  %v77_v24 = vmul.f32 0.6931472, %v128_v21 }
  0x3b   :  { %v86_v26 = vmul.f32 0.6931472, %v130_v23 }
  0x3c   :  { %v83_v27 = vsel %vm82_vm2, %v80_v20, %v77_v24 }
  0x3d   :  { %v93_v29 = vmul.f32 10.0, %v83_v27  ;;  %v92_v30 = vsel %vm91_vm3, %v89_v22, %v86_v26 }
  0x3e   :  { %v94_v31 = vmul.f32 10.0, %v92_v30 }
  0x3f   :  { %v97_v32 = vsel %vm71_vm4, %v93_v29, %v121_v25 }
  0x40   :  { %v98_v33 = vsel %vm72_vm5, %v94_v31, %v122_v28  ;;  %103 = vst [vmem:[#allocation7] sm:$0xff] %v97_v32 }
  0x41   :  { %104 = vst [vmem:[#allocation7 + $0x8] sm:$0xff] %v98_v33 }
  0x42   :  { %186 = shalt.err (!%p183_p6)
}
  0x43   :  { %s187_s8 = scalar_lea.hbm %s259_s2, 256 }
  0x44   :  { %p188_p7 = scmp.ne.s32.totalorder %s259_s2, %s187_s8  ;;  %p191_p8 = scmp.lt.u32.totalorder %s187_s8, %s259_s2 }
  0x46   :  { %p193_p9 = pnand %p191_p8, %p188_p7 }
  0x48   :  { %196 = shalt.err (!%p193_p9)
}
  0x49   :  { %114 = dma.vmem_to_hbm [thread:$0]  %s112_s4, 256, %s259_s2, [#allocation4]  }
  0x4a   :  { %201 = dma.done.wait [#allocation4], 256  }
  0x4b   :  { %202 = vsyncadd [#allocation4], 4294967040 }
  0x4c   :  { %118 = vsyncpa [#allocation3], 1 }
  0x4d   :  { %119 = vsyncpa [#allocation6], 1 }
  0x4e   :  { %120 = vsyncpa [#allocation4], 1 }

</bundles_post_ra>
